<compile_context>
chip_gen: v6e
topology: v6e:2x2x1
jax: 0.10.0
libtpu: 0.0.40
codegen_flags: <defaults>
</compile_context>

<pallas_src>
import functools

import numpy as np

import jax
import jax.numpy as jnp
from jax.experimental import pallas as pl
from jax.experimental.pallas import tpu as pltpu


def _round_up(x, m):
    return ((x + m - 1) // m) * m


def _vmem_limit_bytes():
    # ~half of physical VMEM, capped at 64 MiB (v5e/v6e: 128 MiB, v7x: 64 MiB).
    try:
        cap = pltpu.get_tpu_info().vmem_capacity_bytes
        return int(min(cap // 2, 64 * 1024 * 1024))
    except Exception:
        return 32 * 1024 * 1024


_VMEM_LIMIT = _vmem_limit_bytes()


def _cparams(semantics=None):
    if semantics is None:
        return pltpu.CompilerParams(vmem_limit_bytes=_VMEM_LIMIT)
    return pltpu.CompilerParams(dimension_semantics=tuple(semantics),
                                vmem_limit_bytes=_VMEM_LIMIT)


# ------------------------- tiled MXU matmul with fused BN partial stats -------------------------

def _matmul_kernel(a_ref, b_ref, o_ref, sum_ref, sq_ref, acc_ref):
    @pl.when(pl.program_id(2) == 0)
    def _():
        acc_ref[...] = jnp.zeros_like(acc_ref)

    acc_ref[...] += jnp.dot(a_ref[...], b_ref[...],
                            preferred_element_type=jnp.float32)

    @pl.when(pl.program_id(2) == pl.num_programs(2) - 1)
    def _():
        acc = acc_ref[...]
        o_ref[...] = acc.astype(o_ref.dtype)
        sum_ref[...] = jnp.sum(acc, axis=0, keepdims=True)
        sq_ref[...] = jnp.sum(acc * acc, axis=0, keepdims=True)


def matmul_pallas(a, b, out_dtype=jnp.bfloat16):
    """C = A @ B (bf16 operands, f32 accumulation) plus per-channel sum/sumsq.

    Returns (C[:M,:N] in out_dtype, col_sum (N,) f32, col_sumsq (N,) f32).
    Zero-padded A rows / B columns contribute nothing to the statistics.
    """
    M, K = a.shape
    _, N = b.shape
    tm = min(512, _round_up(M, 16))
    tn = min(512, N) if N % 128 == 0 else N       # full-dim block when ragged
    tk = K if K <= 512 else 512                   # no K padding for small K
    Mp, Kp, Np = _round_up(M, tm), _round_up(K, tk), _round_up(N, tn)
    a_p = a.astype(jnp.bfloat16)
    b_p = b.astype(jnp.bfloat16)
    if (Mp, Kp) != (M, K):
        a_p = jnp.pad(a_p, ((0, Mp - M), (0, Kp - K)))
    if (Kp, Np) != (K, N):
        b_p = jnp.pad(b_p, ((0, Kp - K), (0, Np - N)))
    gi, gj, gk = Mp // tm, Np // tn, Kp // tk
    out, psum, psq = pl.pallas_call(
        _matmul_kernel,
        out_shape=(jax.ShapeDtypeStruct((Mp, Np), out_dtype),
                   jax.ShapeDtypeStruct((gi, 1, Np), jnp.float32),
                   jax.ShapeDtypeStruct((gi, 1, Np), jnp.float32)),
        grid=(gi, gj, gk),
        in_specs=[pl.BlockSpec((tm, tk), lambda i, j, k: (i, k)),
                  pl.BlockSpec((tk, tn), lambda i, j, k: (k, j))],
        out_specs=(pl.BlockSpec((tm, tn), lambda i, j, k: (i, j)),
                   pl.BlockSpec((None, 1, tn), lambda i, j, k: (i, 0, j)),
                   pl.BlockSpec((None, 1, tn), lambda i, j, k: (i, 0, j))),
        scratch_shapes=[pltpu.VMEM((tm, tn), jnp.float32)],
        compiler_params=_cparams(("parallel", "parallel", "arbitrary")),
        cost_estimate=pl.CostEstimate(
            flops=2 * Mp * Np * Kp,
            transcendentals=0,
            bytes_accessed=(Mp * Kp + Kp * Np) * 2 + Mp * Np * 2),
    )(a_p, b_p)
    ch_sum = jnp.sum(psum, axis=(0, 1))[:N]
    ch_sq = jnp.sum(psq, axis=(0, 1))[:N]
    return out[:M, :N], ch_sum, ch_sq


# ------------------------- fused 3x3 conv (tap-slab accumulation + BN stats) -------------------------

def _conv3x3_kernel(*refs, nph, taps, tm, n_tiles):
    phase_refs = refs[:nph]
    w_ref, mask_ref = refs[nph], refs[nph + 1]
    o_ref, sum_ref, sq_ref = refs[nph + 2], refs[nph + 3], refs[nph + 4]

    if n_tiles == 1:
        base = 0                                   # static offsets
    else:
        base = pl.multiple_of(pl.program_id(1) * tm, 16)

    acc = None
    for t, (ph, off) in enumerate(taps):
        xt = phase_refs[ph][pl.ds(base + off, tm), :]     # contiguous slab slice
        d = jnp.dot(xt, w_ref[t], preferred_element_type=jnp.float32)
        acc = d if acc is None else acc + d
    o_ref[...] = acc.astype(o_ref.dtype)

    # Fused BN partial statistics; mask zeroes junk columns and padded tail rows.
    accm = acc * mask_ref[...]
    sum_ref[...] = jnp.sum(accm, axis=0, keepdims=True)
    sq_ref[...] = jnp.sum(accm * acc, axis=0, keepdims=True)


def conv3x3_pallas(x_nhwc, w_oihw, stride):
    """3x3 conv, padding=1, stride 1 or 2, bias-free.  Fused tap accumulation
    (no im2col in HBM), bf16 output, fused per-tile BN partial statistics."""
    Nb, H, W, Cin = x_nhwc.shape
    Cout = w_oihw.shape[0]
    Ho = (H + 2 - 3) // stride + 1
    Wo = (W + 2 - 3) // stride + 1
    w_taps = (jnp.transpose(w_oihw, (2, 3, 1, 0))
              .reshape(9, Cin, Cout).astype(jnp.bfloat16))
    xb = x_nhwc.astype(jnp.bfloat16)

    if stride == 1:
        wrow = W + 2
        m_rows = Ho * wrow
        tm = min(512, _round_up(m_rows, 16))
        m_pad = _round_up(m_rows, tm)
        max_off = 2 * wrow + 2
        hp_need = -(-(m_pad + max_off) // wrow)          # padded rows needed
        bot = max(2, hp_need - H - 1)
        # TODO(synk): zero padding is still an XLA-side copy of the activation.
        xp = jnp.pad(xb, ((0, 0), (1, bot), (1, 1), (0, 0)))
        phases = [xp.reshape(Nb, (H + 1 + bot) * wrow, Cin)]
        taps = tuple((0, dy * wrow + dx)
                     for dy in range(3) for dx in range(3))
    else:  # stride == 2: 4 row/col parity phases, each stride-1 indexed
        wrow = Wo + 1
        m_rows = Ho * wrow
        tm = min(512, _round_up(m_rows, 16))
        m_pad = _round_up(m_rows, tm)
        max_off = wrow + 1
        hp_phase = -(-(m_pad + max_off) // wrow)         # rows per parity phase
        Hp, Wp = 2 * hp_phase, 2 * wrow
        # TODO(synk): parity extraction is still an XLA-side strided copy.
        xp = jnp.pad(xb, ((0, 0), (1, Hp - H - 1), (1, Wp - W - 1), (0, 0)))
        phases = [xp[:, p::2, q::2, :].reshape(Nb, hp_phase * wrow, Cin)
                  for p in range(2) for q in range(2)]
        taps = tuple((2 * (dy & 1) + (dx & 1), (dy // 2) * wrow + dx // 2)
                     for dy in range(3) for dx in range(3))

    nph = len(phases)
    n_tiles = m_pad // tm
    lph = phases[0].shape[1]

    rows = np.arange(m_pad)
    valid = ((rows % wrow) < Wo) & (rows < m_rows)
    mask = jnp.asarray(valid.astype(np.float32).reshape(m_pad, 1))

    kern = functools.partial(_conv3x3_kernel, nph=nph, taps=taps, tm=tm,
                             n_tiles=n_tiles)
    in_specs = [pl.BlockSpec((None, lph, Cin), lambda n, r: (n, 0, 0))
                for _ in range(nph)]
    in_specs.append(pl.BlockSpec((9, Cin, Cout), lambda n, r: (0, 0, 0)))
    in_specs.append(pl.BlockSpec((tm, 1), lambda n, r: (r, 0)))
    out_specs = (pl.BlockSpec((None, tm, Cout), lambda n, r: (n, r, 0)),
                 pl.BlockSpec((None, None, 1, Cout), lambda n, r: (n, r, 0, 0)),
                 pl.BlockSpec((None, None, 1, Cout), lambda n, r: (n, r, 0, 0)))
    phase_bytes = sum(int(p.size) * 2 for p in phases)

    out, psum, psq = pl.pallas_call(
        kern,
        out_shape=(jax.ShapeDtypeStruct((Nb, m_pad, Cout), jnp.bfloat16),
                   jax.ShapeDtypeStruct((Nb, n_tiles, 1, Cout), jnp.float32),
                   jax.ShapeDtypeStruct((Nb, n_tiles, 1, Cout), jnp.float32)),
        grid=(Nb, n_tiles),
        in_specs=in_specs,
        out_specs=out_specs,
        compiler_params=_cparams(("parallel", "parallel")),
        cost_estimate=pl.CostEstimate(
            flops=2 * Nb * m_pad * Cin * Cout * 9,
            transcendentals=0,
            bytes_accessed=phase_bytes + int(w_taps.size) * 2
                           + Nb * m_pad * Cout * 2),
    )(*phases, w_taps, mask)

    out = out[:, :m_rows, :].reshape(Nb, Ho, wrow, Cout)[:, :, :Wo, :]
    ch_sum = jnp.sum(psum, axis=(0, 1, 2))
    ch_sq = jnp.sum(psq, axis=(0, 1, 2))
    return out, ch_sum, ch_sq


def conv1x1_pallas(x_nhwc, w_oihw, stride):
    """1x1 conv (downsample path): spatial subsample + channel matmul."""
    if stride > 1:
        x_nhwc = x_nhwc[:, ::stride, ::stride, :]
    Nb, Ho, Wo, Cin = x_nhwc.shape
    Cout = w_oihw.shape[0]
    x2 = x_nhwc.reshape(Nb * Ho * Wo, Cin)
    wmat = w_oihw.reshape(Cout, Cin).T
    out, ch_sum, ch_sq = matmul_pallas(x2, wmat)
    return out.reshape(Nb, Ho, Wo, Cout), ch_sum, ch_sq


def conv2d_im2col_pallas(x_nhwc, w_oihw, stride, pad):
    """Stem 7x7 conv: XLA im2col (K=147, tiny 3-channel input) + tiled matmul."""
    Nb, H, W, Cin = x_nhwc.shape
    Cout, _, kh, kw = w_oihw.shape
    xp = jnp.pad(x_nhwc.astype(jnp.bfloat16),
                 ((0, 0), (pad, pad), (pad, pad), (0, 0)))
    Ho = (H + 2 * pad - kh) // stride + 1
    Wo = (W + 2 * pad - kw) // stride + 1
    cols = []
    for dy in range(kh):
        for dx in range(kw):
            cols.append(xp[:, dy:dy + stride * (Ho - 1) + 1:stride,
                            dx:dx + stride * (Wo - 1) + 1:stride, :])
    patches = jnp.stack(cols, axis=3).reshape(Nb * Ho * Wo, kh * kw * Cin)
    wmat = jnp.transpose(w_oihw, (2, 3, 1, 0)).reshape(kh * kw * Cin, Cout)
    out, ch_sum, ch_sq = matmul_pallas(patches, wmat)
    return out.reshape(Nb, Ho, Wo, Cout), ch_sum, ch_sq


# ------------------------- BatchNorm apply (+residual, +ReLU), row-tiled -------------------------

def _bn_apply_kernel(x_ref, scale_ref, shift_ref, o_ref, *, relu):
    y = x_ref[...].astype(jnp.float32) * scale_ref[...] + shift_ref[...]
    if relu:
        y = jnp.maximum(y, 0.0)
    o_ref[...] = y.astype(o_ref.dtype)


def _bn_apply_res_kernel(x_ref, scale_ref, shift_ref, res_ref, o_ref, *, relu):
    y = (x_ref[...].astype(jnp.float32) * scale_ref[...] + shift_ref[...]
         + res_ref[...].astype(jnp.float32))
    if relu:
        y = jnp.maximum(y, 0.0)
    o_ref[...] = y.astype(o_ref.dtype)


def bn_apply_pallas(x_nhwc, ch_sum, ch_sq, count, gamma, beta,
                    residual=None, relu=True, eps=1e-5):
    """BN (train-mode batch statistics, biased variance) + optional residual + ReLU.

    Statistics come pre-reduced from the conv kernels' fused epilogue.
    TODO(synk): running-stat updates (training-time side effect) are not modeled.
    """
    Nb, H, W, C = x_nhwc.shape
    M = Nb * H * W
    inv_cnt = 1.0 / float(count)
    mean = ch_sum.astype(jnp.float32) * inv_cnt
    # E[x^2]-mean^2 in f32; conv outputs here are ~zero-mean so cancellation
    # risk is negligible at these magnitudes.
    var = jnp.maximum(ch_sq.astype(jnp.float32) * inv_cnt - mean * mean, 0.0)
    inv = jax.lax.rsqrt(var + eps)
    g = gamma.astype(jnp.float32)
    scale = (g * inv).reshape(1, C)
    shift = (beta.astype(jnp.float32) - mean * g * inv).reshape(1, C)

    x2 = x_nhwc.reshape(M, C)
    tile = M if M <= 1024 else 1024
    grid = (pl.cdiv(M, tile),)
    row_spec = pl.BlockSpec((tile, C), lambda i: (i, 0))
    vec_spec = pl.BlockSpec((1, C), lambda i: (0, 0))

    if residual is None:
        out = pl.pallas_call(
            functools.partial(_bn_apply_kernel, relu=relu),
            out_shape=jax.ShapeDtypeStruct((M, C), jnp.bfloat16),
            grid=grid,
            in_specs=[row_spec, vec_spec, vec_spec],
            out_specs=row_spec,
            compiler_params=_cparams(("parallel",)),
        )(x2, scale, shift)
    else:
        r2 = residual.reshape(M, C)
        out = pl.pallas_call(
            functools.partial(_bn_apply_res_kernel, relu=relu),
            out_shape=jax.ShapeDtypeStruct((M, C), jnp.bfloat16),
            grid=grid,
            in_specs=[row_spec, vec_spec, vec_spec, row_spec],
            out_specs=row_spec,
            compiler_params=_cparams(("parallel",)),
        )(x2, scale, shift, r2)
    return out.reshape(Nb, H, W, C)


# ------------------------- MaxPool 3x3 / stride 2 / pad 1 -------------------------

def _maxpool_kernel(p00_ref, p01_ref, p10_ref, p11_ref, o_ref, *, Ho, Wo):
    phases = (p00_ref, p01_ref, p10_ref, p11_ref)
    out = None
    for dy in range(3):
        for dx in range(3):
            ph = phases[2 * (dy & 1) + (dx & 1)]
            win = ph[pl.ds(dy // 2, Ho), pl.ds(dx // 2, Wo), :].astype(jnp.float32)
            out = win if out is None else jnp.maximum(out, win)
    o_ref[...] = out.astype(o_ref.dtype)


def maxpool_pallas(x_nhwc):
    Nb, H, W, C = x_nhwc.shape
    Ho = (H + 2 - 3) // 2 + 1
    Wo = (W + 2 - 3) // 2 + 1
    Hp, Wp = 2 * (Ho + 1), 2 * (Wo + 1)
    # TODO(synk): -inf padding + parity extraction are still XLA-side copies.
    xp = jnp.pad(x_nhwc, ((0, 0), (1, Hp - H - 1), (1, Wp - W - 1), (0, 0)),
                 constant_values=-jnp.inf)
    phases = [xp[:, p::2, q::2, :] for p in range(2) for q in range(2)]
    kern = functools.partial(_maxpool_kernel, Ho=Ho, Wo=Wo)
    return pl.pallas_call(
        kern,
        out_shape=jax.ShapeDtypeStruct((Nb, Ho, Wo, C), x_nhwc.dtype),
        grid=(Nb,),
        in_specs=[pl.BlockSpec((None, Ho + 1, Wo + 1, C),
                               lambda n: (n, 0, 0, 0))] * 4,
        out_specs=pl.BlockSpec((None, Ho, Wo, C), lambda n: (n, 0, 0, 0)),
        compiler_params=_cparams(("parallel",)),
    )(*phases)


# ------------------------- global AvgPool + Linear -------------------------

def _avgpool_kernel(x_ref, o_ref):
    o_ref[...] = jnp.mean(x_ref[...].astype(jnp.float32), axis=1)


def avgpool_pallas(x_nhwc):
    Nb, H, W, C = x_nhwc.shape
    x3 = x_nhwc.reshape(Nb, H * W, C)
    return pl.pallas_call(
        _avgpool_kernel,
        out_shape=jax.ShapeDtypeStruct((Nb, C), jnp.float32),
        grid=(1,),
        in_specs=[pl.BlockSpec((Nb, H * W, C), lambda i: (0, 0, 0))],
        out_specs=pl.BlockSpec((Nb, C), lambda i: (0, 0)),
        compiler_params=_cparams(),
    )(x3)


def _linear_kernel(x_ref, w_ref, b_ref, o_ref):
    o_ref[...] = jnp.dot(x_ref[...], w_ref[...],
                         preferred_element_type=jnp.float32) + b_ref[...]


def linear_pallas(x, w, b):
    # w: [out, in] (PyTorch layout).  Output lane-padded to 128 for dense stores.
    Nb, Cin = x.shape
    Cout = w.shape[0]
    cpad = _round_up(Cout, 128)
    wt = jnp.pad(w.T.astype(jnp.bfloat16), ((0, 0), (0, cpad - Cout)))
    bp = jnp.pad(b.astype(jnp.float32), (0, cpad - Cout)).reshape(1, cpad)
    out = pl.pallas_call(
        _linear_kernel,
        out_shape=jax.ShapeDtypeStruct((Nb, cpad), jnp.float32),
        grid=(1,),
        in_specs=[pl.BlockSpec((Nb, Cin), lambda i: (0, 0)),
                  pl.BlockSpec((Cin, cpad), lambda i: (0, 0)),
                  pl.BlockSpec((1, cpad), lambda i: (0, 0))],
        out_specs=pl.BlockSpec((Nb, cpad), lambda i: (0, 0)),
        compiler_params=_cparams(),
    )(x.astype(jnp.bfloat16), wt, bp)
    return out[:, :Cout]


# ------------------------- parameters & forward -------------------------

def init_resnet_params(key, layers=(1, 1, 1, 1), num_classes=10):
    params = {}
    keys = iter(jax.random.split(key, 256))

    def conv_w(cout, cin, k):
        # kaiming_normal_(mode='fan_out', nonlinearity='relu')
        fan_out = cout * k * k
        std = (2.0 / fan_out) ** 0.5
        return jax.random.normal(next(keys), (cout, cin, k, k), jnp.float32) * std

    params['conv1'] = conv_w(64, 3, 7)
    params['bn1_g'] = jnp.ones((64,), jnp.float32)
    params['bn1_b'] = jnp.zeros((64,), jnp.float32)

    expansion = 1  # BasicBlock
    in_planes = 64
    for li, (planes, nblocks, stride0) in enumerate(
            zip((64, 128, 256, 512), layers, (1, 2, 2, 2)), start=1):
        blocks = []
        for bi in range(nblocks):
            stride = stride0 if bi == 0 else 1
            bp = {'stride': stride}
            bp['conv1'] = conv_w(planes, in_planes, 3)
            bp['bn1_g'] = jnp.ones((planes,), jnp.float32)
            bp['bn1_b'] = jnp.zeros((planes,), jnp.float32)
            bp['conv2'] = conv_w(planes, planes, 3)
            bp['bn2_g'] = jnp.ones((planes,), jnp.float32)
            bp['bn2_b'] = jnp.zeros((planes,), jnp.float32)
            if stride != 1 or in_planes != planes * expansion:
                bp['ds_conv'] = conv_w(planes * expansion, in_planes, 1)
                bp['ds_g'] = jnp.ones((planes * expansion,), jnp.float32)
                bp['ds_b'] = jnp.zeros((planes * expansion,), jnp.float32)
            in_planes = planes * expansion
            blocks.append(bp)
        params[f'layer{li}'] = blocks

    fan_in = 512 * expansion
    bound = 1.0 / (fan_in ** 0.5)
    params['fc_w'] = jax.random.uniform(next(keys), (num_classes, fan_in),
                                        jnp.float32, -bound, bound)
    params['fc_b'] = jax.random.uniform(next(keys), (num_classes,),
                                        jnp.float32, -bound, bound)
    return params


def basic_block_forward(x, bp):
    stride = bp['stride']
    identity = x
    out, s1, q1 = conv3x3_pallas(x, bp['conv1'], stride)
    cnt1 = out.shape[0] * out.shape[1] * out.shape[2]
    out = bn_apply_pallas(out, s1, q1, cnt1, bp['bn1_g'], bp['bn1_b'], relu=True)
    out2, s2, q2 = conv3x3_pallas(out, bp['conv2'], 1)
    cnt2 = out2.shape[0] * out2.shape[1] * out2.shape[2]
    if 'ds_conv' in bp:
        idn, sd, qd = conv1x1_pallas(x, bp['ds_conv'], stride)
        cntd = idn.shape[0] * idn.shape[1] * idn.shape[2]
        identity = bn_apply_pallas(idn, sd, qd, cntd, bp['ds_g'], bp['ds_b'],
                                   relu=False)
    # out = relu(bn2(conv2) + identity): residual add fused into the BN kernel.
    out = bn_apply_pallas(out2, s2, q2, cnt2, bp['bn2_g'], bp['bn2_b'],
                          residual=identity, relu=True)
    return out


def resnet_forward(params, x_nchw):
    x = jnp.transpose(x_nchw.astype(jnp.float32), (0, 2, 3, 1))  # NCHW -> NHWC
    y, s, q = conv2d_im2col_pallas(x, params['conv1'], stride=2, pad=3)
    cnt = y.shape[0] * y.shape[1] * y.shape[2]
    x = bn_apply_pallas(y, s, q, cnt, params['bn1_g'], params['bn1_b'], relu=True)
    x = maxpool_pallas(x)
    for lname in ('layer1', 'layer2', 'layer3', 'layer4'):
        for bp in params[lname]:
            x = basic_block_forward(x, bp)
    x = avgpool_pallas(x)                      # [N, 512]  (avgpool + flatten)
    logits = linear_pallas(x, params['fc_w'], params['fc_b'])
    return logits


if __name__ == "__main__":
    key = jax.random.PRNGKey(0)
    pkey, xkey = jax.random.split(key)
    params = init_resnet_params(pkey, layers=(1, 1, 1, 1), num_classes=10)
    x = jax.random.normal(xkey, (2, 3, 16, 16), jnp.float32)  # NCHW like PyTorch
    out = resnet_forward(params, x)
    out = jax.block_until_ready(out)
    assert out.shape == (2, 10), out.shape
    assert bool(jnp.all(jnp.isfinite(out)))
    print("KERNEL_OK")
</pallas_src>

<mosaic_0001>
module attributes {stable_mosaic.version = 11 : i64} {
  func.func @_matmul_kernel(%arg0: i32, %arg1: i32, %arg2: i32, %arg3: memref<128x147xbf16, #tpu.memory_space<vmem>>, %arg4: memref<147x64xbf16, #tpu.memory_space<vmem>>, %arg5: memref<128x64xbf16, #tpu.memory_space<vmem>>, %arg6: memref<1x1x64xf32, #tpu.memory_space<vmem>>, %arg7: memref<1x1x64xf32, #tpu.memory_space<vmem>>, %arg8: memref<128x64xf32, #tpu.memory_space<vmem>>) attributes {dimension_semantics = [#tpu.dimension_semantics<parallel>, #tpu.dimension_semantics<parallel>, #tpu.dimension_semantics<arbitrary>], iteration_bounds = array<i64: 1, 1, 1>, scalar_prefetch = 0 : i64, scratch_operands = 1 : i64, tpu.core_type = #tpu.core_type<tc>, window_params = [{transform_indices = @transform_0, window_bounds = array<i64: 128, 147>}, {transform_indices = @transform_1, window_bounds = array<i64: 147, 64>}, {transform_indices = @transform_2, window_bounds = array<i64: 128, 64>}, {transform_indices = @transform_3, window_bounds = array<i64: 1, 1, 64>}, {transform_indices = @transform_4, window_bounds = array<i64: 1, 1, 64>}]} {
    %c0_i32 = arith.constant 0 : i32
    %0 = arith.cmpi eq, %arg2, %c0_i32 : i32
    %1 = arith.extui %0 : i1 to i32
    %c0_i32_0 = arith.constant 0 : i32
    %2 = arith.cmpi ne, %1, %c0_i32_0 : i32
    scf.if %2 {
      %cst_10 = arith.constant 0.000000e+00 : f32
      %12 = vector.broadcast %cst_10 : f32 to vector<128x64xf32>
      %c0_11 = arith.constant 0 : index
      %c0_12 = arith.constant 0 : index
      %13 = vector.load %arg8[%c0_11, %c0_12] : memref<128x64xf32, #tpu.memory_space<vmem>>, vector<128x64xf32>
      tpu.vector_store %arg8[%c0_11, %c0_12], %12 {strides = array<i32>} : memref<128x64xf32, #tpu.memory_space<vmem>>, vector<128x64xf32>,
    } else {
    }
    %c0 = arith.constant 0 : index
    %c0_1 = arith.constant 0 : index
    %3 = vector.load %arg8[%c0, %c0_1] : memref<128x64xf32, #tpu.memory_space<vmem>>, vector<128x64xf32>
    %c0_2 = arith.constant 0 : index
    %c0_3 = arith.constant 0 : index
    %4 = vector.load %arg3[%c0_2, %c0_3] : memref<128x147xbf16, #tpu.memory_space<vmem>>, vector<128x147xbf16>
    %c0_4 = arith.constant 0 : index
    %c0_5 = arith.constant 0 : index
    %5 = vector.load %arg4[%c0_4, %c0_5] : memref<147x64xbf16, #tpu.memory_space<vmem>>, vector<147x64xbf16>
    %cst = arith.constant dense<0.000000e+00> : vector<128x64xf32>
    %6 = tpu.matmul %4, %5, %cst {dimension_numbers = #tpu.dot_dimension_numbers<[1], [0], [0], [1], [0, 0, 1, 1], [], []>} : vector<128x147xbf16>, vector<147x64xbf16>, vector<128x64xf32> -> vector<128x64xf32>
    %7 = arith.addf %3, %6 : vector<128x64xf32>
    %c0_6 = arith.constant 0 : index
    %c0_7 = arith.constant 0 : index
    %8 = vector.load %arg8[%c0_6, %c0_7] : memref<128x64xf32, #tpu.memory_space<vmem>>, vector<128x64xf32>
    tpu.vector_store %arg8[%c0_6, %c0_7], %7 {strides = array<i32>} : memref<128x64xf32, #tpu.memory_space<vmem>>, vector<128x64xf32>,
    %c0_i32_8 = arith.constant 0 : i32
    %9 = arith.cmpi eq, %arg2, %c0_i32_8 : i32
    %10 = arith.extui %9 : i1 to i32
    %c0_i32_9 = arith.constant 0 : i32
    %11 = arith.cmpi ne, %10, %c0_i32_9 : i32
    scf.if %11 {
      %c0_10 = arith.constant 0 : index
      %c0_11 = arith.constant 0 : index
      %12 = vector.load %arg8[%c0_10, %c0_11] : memref<128x64xf32, #tpu.memory_space<vmem>>, vector<128x64xf32>
      %13 = arith.truncf %12 : vector<128x64xf32> to vector<128x64xbf16>
      %c0_12 = arith.constant 0 : index
      %c0_13 = arith.constant 0 : index
      %14 = vector.load %arg5[%c0_12, %c0_13] : memref<128x64xbf16, #tpu.memory_space<vmem>>, vector<128x64xbf16>
      tpu.vector_store %arg5[%c0_12, %c0_13], %13 {strides = array<i32>} : memref<128x64xbf16, #tpu.memory_space<vmem>>, vector<128x64xbf16>,
      %cst_14 = arith.constant dense<0.000000e+00> : vector<64xf32>
      %15 = vector.multi_reduction <add>, %12, %cst_14 [0] : vector<128x64xf32> to vector<64xf32>
      %16 = vector.shape_cast %15 : vector<64xf32> to vector<1x64xf32>
      %c0_15 = arith.constant 0 : index
      %c0_16 = arith.constant 0 : index
      %c0_17 = arith.constant 0 : index
      %17 = vector.load %arg6[%c0_15, %c0_16, %c0_17] : memref<1x1x64xf32, #tpu.memory_space<vmem>>, vector<1x1x64xf32>
      %18 = vector.shape_cast %17 : vector<1x1x64xf32> to vector<1x64xf32>
      %19 = vector.shape_cast %16 : vector<1x64xf32> to vector<1x1x64xf32>
      tpu.vector_store %arg6[%c0_15, %c0_16, %c0_17], %19 {strides = array<i32>} : memref<1x1x64xf32, #tpu.memory_space<vmem>>, vector<1x1x64xf32>,
      %20 = arith.mulf %12, %12 : vector<128x64xf32>
      %cst_18 = arith.constant dense<0.000000e+00> : vector<64xf32>
      %21 = vector.multi_reduction <add>, %20, %cst_18 [0] : vector<128x64xf32> to vector<64xf32>
      %22 = vector.shape_cast %21 : vector<64xf32> to vector<1x64xf32>
      %c0_19 = arith.constant 0 : index
      %c0_20 = arith.constant 0 : index
      %c0_21 = arith.constant 0 : index
      %23 = vector.load %arg7[%c0_19, %c0_20, %c0_21] : memref<1x1x64xf32, #tpu.memory_space<vmem>>, vector<1x1x64xf32>
      %24 = vector.shape_cast %23 : vector<1x1x64xf32> to vector<1x64xf32>
      %25 = vector.shape_cast %22 : vector<1x64xf32> to vector<1x1x64xf32>
      tpu.vector_store %arg7[%c0_19, %c0_20, %c0_21], %25 {strides = array<i32>} : memref<1x1x64xf32, #tpu.memory_space<vmem>>, vector<1x1x64xf32>,
    } else {
    }
    return
  }
  func.func @transform_0(%arg0: i32, %arg1: i32, %arg2: i32) -> (i32, i32) {
    %c0_i32 = arith.constant 0 : i32
    return %arg0, %arg2 : i32, i32
  }
  func.func @transform_1(%arg0: i32, %arg1: i32, %arg2: i32) -> (i32, i32) {
    %c0_i32 = arith.constant 0 : i32
    return %arg2, %arg1 : i32, i32
  }
  func.func @transform_2(%arg0: i32, %arg1: i32, %arg2: i32) -> (i32, i32) {
    %c0_i32 = arith.constant 0 : i32
    return %arg0, %arg1 : i32, i32
  }
  func.func @transform_3(%arg0: i32, %arg1: i32, %arg2: i32) -> (i32, i32, i32) {
    %c0_i32 = arith.constant 0 : i32
    %c0_i32_0 = arith.constant 0 : i32
    return %arg0, %c0_i32, %arg1 : i32, i32, i32
  }
  func.func @transform_4(%arg0: i32, %arg1: i32, %arg2: i32) -> (i32, i32, i32) {
    %c0_i32 = arith.constant 0 : i32
    %c0_i32_0 = arith.constant 0 : i32
    return %arg0, %c0_i32, %arg1 : i32, i32, i32
  }
}

</mosaic_0001>

<bundles_post_ra>
// kernel: tpu_custom_call.1
= control target key start
LH: loop header
LB: loop body
LE: loop exit
PB: predicated region body
PF: predicated region fallthrough
CT: control target
= control target key end

     0   :  { %10 = vsyncpa [#allocation4], 0  ;;  %v774_v1 = vmov 0   ;;  %vm21_vm0 = vcmask 523264   ;;  %vm218_vm1 = vcmask 154624   ;;  %v775_v6 = vmov 0.0   ;;  %s1095_s0 = inlined_call_operand.vmem [shape: bf16[128,147], index: 0, kind: input, shape index: {}]   ;;  %s1096_s1 = inlined_call_operand.vmem [shape: bf16[147,64], index: 1, kind: input, shape index: {}]   ;;  %s1097_s2 = inlined_call_operand.vmem [shape: bf16[128,64], index: 2, kind: output, shape index: {0}]   ;;  %s1098_s3 = inlined_call_operand.hbm [shape: f32[1,1,64], index: 3, kind: output, shape index: {1}]   ;;  %s1099_s4 = inlined_call_operand.hbm [shape: f32[1,1,64], index: 4, kind: output, shape index: {2}]  }
   0x1   :  { %v696_v0 = vld [vmem:[%s1096_s1 + $0x38] sm:$0xff]   ;;  %250 = vmatprep.subr.bf16.mxu0 %v774_v1  ;;  %671 = vmatprep.subr.bf16.mxu1 %v774_v1  ;;  %v697_v2 = vld [vmem:[%s1096_s1 + $0x30] sm:$0xff]   ;;  %v698_v3 = vld [vmem:[%s1096_s1 + $0x28] sm:$0xff]   ;;  %22 = vst.msk [vmem:[#allocation2] sm:$0xff] %vm21_vm0, %v775_v6 }
   0x2   :  { %251 = vmatpush1.bf16.msra.mxu0 %v696_v0  ;;  %681 = vmatpush1.bf16.msra.mxu1 %v696_v0  ;;  %v699_v4 = vld [vmem:[%s1096_s1 + $0x20] sm:$0xff]   ;;  %23 = vst.msk [vmem:[#allocation2 + $0x8] sm:$0xff] %vm21_vm0, %v775_v6  ;;  %24 = vst.msk [vmem:[#allocation2 + $0x10] sm:$0xff] %vm21_vm0, %v775_v6  ;;  %v700_v8 = vld [vmem:[%s1096_s1 + $0x18] sm:$0xff]  }
   0x3   :  { %252 = vmatprep.subr.bf16.mxu0 %v774_v1  ;;  %672 = vmatprep.subr.bf16.mxu1 %v774_v1  ;;  %v708_v5 = vld [vmem:[%s1095_s0 + $0x4] ss:$8 sps:$4 sm:$0xff]   ;;  %25 = vst.msk [vmem:[#allocation2 + $0x18] sm:$0xff] %vm21_vm0, %v775_v6  ;;  %26 = vst.msk [vmem:[#allocation2 + $0x20] sm:$0xff] %vm21_vm0, %v775_v6  ;;  %v701_v9 = vld [vmem:[%s1096_s1 + $0x10] sm:$0xff]  }
   0x4   :  { %27 = vst.msk [vmem:[#allocation2 + $0x28] sm:$0xff] %vm21_vm0, %v775_v6  ;;  %28 = vst.msk [vmem:[#allocation2 + $0x30] sm:$0xff] %vm21_vm0, %v775_v6  ;;  %631 = vmatprep.mubr.msk.bf16.mxu0 %vm218_vm1, %v708_v5  ;;  %v714_v7 = vld [vmem:[%s1095_s0 + $0x44] ss:$8 sps:$4 sm:$0xff]  }
   0x5   :  { %29 = vst.msk [vmem:[#allocation2 + $0x38] sm:$0xff] %vm21_vm0, %v775_v6  ;;  %30 = vst.msk [vmem:[#allocation2 + $0x40] sm:$0xff] %vm21_vm0, %v775_v6  ;;  %635 = vmatprep.mubr.msk.bf16.mxu1 %vm218_vm1, %v714_v7 }
   0x6   :  { %253 = vmatpush1.bf16.msra.mxu0 %v697_v2  ;;  %682 = vmatpush1.bf16.msra.mxu1 %v697_v2  ;;  %31 = vst.msk [vmem:[#allocation2 + $0x48] sm:$0xff] %vm21_vm0, %v775_v6  ;;  %32 = vst.msk [vmem:[#allocation2 + $0x50] sm:$0xff] %vm21_vm0, %v775_v6 }
   0x7   :  { %254 = vmatprep.subr.bf16.mxu0 %v774_v1  ;;  %673 = vmatprep.subr.bf16.mxu1 %v774_v1  ;;  %33 = vst.msk [vmem:[#allocation2 + $0x58] sm:$0xff] %vm21_vm0, %v775_v6  ;;  %34 = vst.msk [vmem:[#allocation2 + $0x60] sm:$0xff] %vm21_vm0, %v775_v6 }
   0x8   :  { %35 = vst.msk [vmem:[#allocation2 + $0x68] sm:$0xff] %vm21_vm0, %v775_v6  ;;  %36 = vst.msk [vmem:[#allocation2 + $0x70] sm:$0xff] %vm21_vm0, %v775_v6 }
   0x9   :  { %37 = vst.msk [vmem:[#allocation2 + $0x78] sm:$0xff] %vm21_vm0, %v775_v6 }
   0xa   :  { %255 = vmatpush1.bf16.msra.mxu0 %v698_v3  ;;  %683 = vmatpush1.bf16.msra.mxu1 %v698_v3 }
   0xb   :  { %256 = vmatprep.subr.bf16.mxu0 %v774_v1  ;;  %674 = vmatprep.subr.bf16.mxu1 %v774_v1 }
   0xe   :  { %257 = vmatpush1.bf16.msra.mxu0 %v699_v4  ;;  %684 = vmatpush1.bf16.msra.mxu1 %v699_v4 }
   0xf   :  { %258 = vmatprep.subr.bf16.mxu0 %v774_v1  ;;  %675 = vmatprep.subr.bf16.mxu1 %v774_v1 }
  0x12   :  { %259 = vmatpush1.bf16.msra.mxu0 %v700_v8  ;;  %685 = vmatpush1.bf16.msra.mxu1 %v700_v8 }
  0x13   :  { %260 = vmatprep.subr.bf16.mxu0 %v774_v1  ;;  %676 = vmatprep.subr.bf16.mxu1 %v774_v1 }
  0x14   :  { %11 = vsyncpa [#allocation6], 0  ;;  %vm243_vm2 = vcmask 1040384   ;;  %v702_v10 = vld [vmem:[%s1096_s1 + $0x8] sm:$0xff]   ;;  %vm244_vm3 = vcmask 1041408   ;;  %v776_v11 = vmov 65535  }
  0x15   :  { %v245_v12 = vsel %vm243_vm2, 4294967295, %v776_v11  ;;  %v703_v13 = vld [vmem:[%s1096_s1] sm:$0xff]   ;;  %v704_v14 = vld [vmem:[%s1096_s1 + $0x48] ss:$0 sps:$4 sm:$0x33]   ;;  %v40_v47 = vld [vmem:[#allocation2 + $0x10] sm:$0xff] }
  0x16   :  { %261 = vmatpush1.bf16.msra.mxu0 %v701_v9  ;;  %686 = vmatpush1.bf16.msra.mxu1 %v701_v9  ;;  %v246_v15 = vsel %vm244_vm3, %v245_v12, 0  ;;  %v705_v17 = vld [vmem:[%s1096_s1 + $0x40] sm:$0xff]   ;;  %v709_v20 = vld [vmem:[%s1095_s0 + $0x14] ss:$8 sps:$4 sm:$0xff]   ;;  %v711_v22 = vld [vmem:[%s1095_s0 + $0x10] ss:$8 sps:$4 sm:$0xff]  }
  0x17   :  { %262 = vmatprep.subr.bf16.mxu0 %v774_v1  ;;  %677 = vmatprep.subr.bf16.mxu1 %v774_v1  ;;  %v248_v16 = vand.u32 %v704_v14, %v246_v15  ;;  %v706_v18 = vld [vmem:[%s1095_s0] ss:$8 sps:$4 sm:$0xff]   ;;  %v718_v21 = vld [vmem:[%s1095_s0 + $0x54] ss:$8 sps:$4 sm:$0xff]   ;;  %v720_v23 = vld [vmem:[%s1095_s0 + $0x50] ss:$8 sps:$4 sm:$0xff]  }
  0x18   :  { %v712_v19 = vld [vmem:[%s1095_s0 + $0x40] ss:$8 sps:$4 sm:$0xff]   ;;  %v715_v24 = vld [vmem:[%s1095_s0 + $0x24] ss:$8 sps:$4 sm:$0xff]   ;;  %v721_v28 = vld [vmem:[%s1095_s0 + $0x34] ss:$8 sps:$4 sm:$0xff]  }
  0x19   :  { %v724_v25 = vld [vmem:[%s1095_s0 + $0x64] ss:$8 sps:$4 sm:$0xff]   ;;  %v717_v26 = vld [vmem:[%s1095_s0 + $0x20] ss:$8 sps:$4 sm:$0xff]   ;;  %v727_v29 = vld [vmem:[%s1095_s0 + $0x74] ss:$8 sps:$4 sm:$0xff]  }
  0x1a   :  { %263 = vmatpush1.bf16.msra.mxu0 %v702_v10  ;;  %687 = vmatpush1.bf16.msra.mxu1 %v702_v10  ;;  %v726_v27 = vld [vmem:[%s1095_s0 + $0x60] ss:$8 sps:$4 sm:$0xff]   ;;  %v723_v30 = vld [vmem:[%s1095_s0 + $0x30] ss:$8 sps:$4 sm:$0xff]   ;;  %vm463_vm4 = vcmask 519168   ;;  %vm517_vm5 = vcmask 516096  }
  0x1b   :  { %264 = vmatprep.subr.bf16.mxu0 %v774_v1  ;;  %678 = vmatprep.subr.bf16.mxu1 %v774_v1  ;;  %v729_v31 = vld [vmem:[%s1095_s0 + $0x70] ss:$8 sps:$4 sm:$0xff]   ;;  %v38_v32 = vld [vmem:[#allocation2] sm:$0xff]  ;;  %v39_v39 = vld [vmem:[#allocation2 + $0x8] sm:$0xff]  ;;  %s778_s18 = smov [#allocation5]  }
  0x1c   :  { %v46_v33 = vld [vmem:[#allocation2 + $0x40] sm:$0xff]  ;;  %v47_v41 = vld [vmem:[#allocation2 + $0x48] sm:$0xff]  ;;  %v48_v49 = vld [vmem:[#allocation2 + $0x50] sm:$0xff]  ;;  %s591_s1 = sshll.u32 %s778_s18, 4  ;;  %s592_s1 = int_to_ptr.vmem [resolvable:$true] %s591_s1 }
  0x1d   :  { %v41_v53 = vld [vmem:[#allocation2 + $0x18] sm:$0xff]  ;;  %v50_v6 = vld [vmem:[#allocation2 + $0x60] sm:$0xff] }
  0x1e   :  { %265 = vmatpush1.bf16.msra.mxu0 %v703_v13  ;;  %688 = vmatpush1.bf16.msra.mxu1 %v703_v13  ;;  %v49_v58 = vld [vmem:[#allocation2 + $0x58] sm:$0xff]  ;;  %v43_v13 = vld [vmem:[#allocation2 + $0x28] sm:$0xff] }
  0x1f   :  { %278 = vmatprep.subr.bf16.mxu0 %v774_v1  ;;  %679 = vmatprep.subr.bf16.mxu1 %v774_v1 }
  0x22   :  { %279 = vmatpush2.bf16.msra.mxu0 %v248_v16  ;;  %689 = vmatpush2.bf16.msra.mxu1 %v248_v16 }
  0x23   :  { %280 = vmatprep.subr.bf16.mxu0 %v774_v1  ;;  %680 = vmatprep.subr.bf16.mxu1 %v774_v1  ;;  %v42_v1 = vld [vmem:[#allocation2 + $0x20] sm:$0xff] }
  0x26   :  { %281 = vmatpush2.bf16.msra.mxu0 %v705_v17  ;;  %690 = vmatpush2.bf16.msra.mxu1 %v705_v17 }
  0x29   :  { %283 = vmatmul.mubr.bf16.vlgmr.msra.gmra.mxu0 %v706_v18  ;;  %315 = vmatmul.mubr.bf16.vlgmr.msra.gmra.mxu1 %v712_v19  ;;  %v51_v18 = vld [vmem:[#allocation2 + $0x68] sm:$0xff] }
  0x2a   :  { %632 = vmatprep.mubr.msk.bf16.mxu0 %vm218_vm1, %v709_v20  ;;  %636 = vmatprep.mubr.msk.bf16.mxu1 %vm218_vm1, %v718_v21 }
  0x31   :  { %291 = vmatmul.mubr.bf16.gmra.mxu0 %v711_v22  ;;  %323 = vmatmul.mubr.bf16.gmra.mxu1 %v720_v23 }
  0x32   :  { %633 = vmatprep.mubr.msk.bf16.mxu0 %vm218_vm1, %v715_v24  ;;  %637 = vmatprep.mubr.msk.bf16.mxu1 %vm218_vm1, %v724_v25  ;;  %v44_v25 = vld [vmem:[#allocation2 + $0x30] sm:$0xff] }
  0x39   :  { %299 = vmatmul.mubr.bf16.gmra.mxu0 %v717_v26  ;;  %331 = vmatmul.mubr.bf16.gmra.mxu1 %v726_v27 }
  0x3a   :  { %634 = vmatprep.mubr.msk.bf16.mxu0 %vm218_vm1, %v721_v28  ;;  %638 = vmatprep.mubr.msk.bf16.mxu1 %vm218_vm1, %v727_v29  ;;  %v52_v29 = vld [vmem:[#allocation2 + $0x70] sm:$0xff] }
  0x41   :  { %307 = vmatmul.mubr.bf16.gmra.mxu0 %v723_v30  ;;  %339 = vmatmul.mubr.bf16.gmra.mxu1 %v729_v31 }
  0xe9   :  { %v284_v34 = vpop.f32.mrf.mxu0  ;;  %v316_v35 = vpop.f32.mrf.mxu1 }
  0xea   :  { %v347_v36 = vadd.f32 %v284_v34, %v38_v32  ;;  %v355_v37 = vadd.f32 %v316_v35, %v46_v33 }
  0xeb   :  { %v286_v38 = vpop.f32.mrf.mxu0  ;;  %v318_v40 = vpop.f32.mrf.mxu1 }
  0xec   :  { %364 = vst.msk [vmem:[#allocation2] sm:$0xff] %vm21_vm0, %v347_v36  ;;  %372 = vst.msk [vmem:[#allocation2 + $0x40] sm:$0xff] %vm21_vm0, %v355_v37  ;;  %v45_v38 = vld [vmem:[#allocation2 + $0x38] sm:$0xff] }
  0xed   :  { %v287_v42 = vpop.f32.mrf.mxu0  ;;  %v319_v43 = vpop.f32.mrf.mxu1 }
  0xee   :  { %v348_v44 = vadd.f32 %v287_v42, %v39_v39  ;;  %v356_v45 = vadd.f32 %v319_v43, %v47_v41 }
  0xef   :  { %v289_v46 = vpop.f32.mrf.mxu0  ;;  %v321_v48 = vpop.f32.mrf.mxu1 }
  0xf0   :  { %365 = vst.msk [vmem:[#allocation2 + $0x8] sm:$0xff] %vm21_vm0, %v348_v44  ;;  %373 = vst.msk [vmem:[#allocation2 + $0x48] sm:$0xff] %vm21_vm0, %v356_v45  ;;  %v53_v44 = vld [vmem:[#allocation2 + $0x78] sm:$0xff] }
  0xf1   :  { %v292_v50 = vpop.f32.mrf.mxu0  ;;  %v324_v51 = vpop.f32.mrf.mxu1 }
  0xf2   :  { %v349_v52 = vadd.f32 %v292_v50, %v40_v47  ;;  %v357_v54 = vadd.f32 %v324_v51, %v48_v49 }
  0xf3   :  { %v930_v55 = vld [vmem:[#allocation2] sm:$0xff]  ;;  %v294_v56 = vpop.f32.mrf.mxu0  ;;  %v326_v57 = vpop.f32.mrf.mxu1 }
  0xf4   :  { %v932_v59 = vld [vmem:[#allocation2 + $0x40] sm:$0xff]  ;;  %v655_v60 = vpack.c.bf16 %v930_v55, %v930_v55  ;;  %366 = vst.msk [vmem:[#allocation2 + $0x10] sm:$0xff] %vm21_vm0, %v349_v52  ;;  %374 = vst.msk [vmem:[#allocation2 + $0x50] sm:$0xff] %vm21_vm0, %v357_v54  ;;  %v519_v41 = vmul.f32 %v930_v55, %v930_v55  ;;  %v480_v50 = vsel %vm21_vm0, %v930_v55, 0.0 }
  0xf5   :  { %v663_v61 = vpack.c.bf16 %v932_v59, %v932_v59  ;;  %v295_v62 = vpop.f32.mrf.mxu0  ;;  %v327_v63 = vpop.f32.mrf.mxu1 }
  0xf6   :  { %464 = vst.msk [vmem:[%s1097_s2] sm:$0xf] %vm463_vm4, %v655_v60  ;;  %v350_v0 = vadd.f32 %v295_v62, %v41_v53  ;;  %v358_v2 = vadd.f32 %v327_v63, %v49_v58 }
  0xf7   :  { %472 = vst.msk [vmem:[%s1097_s2 + $0x20] sm:$0xf] %vm463_vm4, %v663_v61  ;;  %v384_v3 = vld [vmem:[#allocation2 + $0x8] sm:$0xff]  ;;  %v297_v4 = vpop.f32.mrf.mxu0  ;;  %v329_v5 = vpop.f32.mrf.mxu1 }
  0xf8   :  { %v948_v7 = vld [vmem:[#allocation2 + $0x48] sm:$0xff]  ;;  %v656_v8 = vpack.c.bf16 %v384_v3, %v384_v3  ;;  %367 = vst.msk [vmem:[#allocation2 + $0x18] sm:$0xff] %vm21_vm0, %v350_v0  ;;  %375 = vst.msk [vmem:[#allocation2 + $0x58] sm:$0xff] %vm21_vm0, %v358_v2  ;;  %v520_v34 = vmul.f32 %v384_v3, %v384_v3  ;;  %v481_v40 = vsel %vm21_vm0, %v384_v3, 0.0  ;;  %v535_v3 = vsel %vm21_vm0, %v519_v41, 0.0 }
  0xf9   :  { %v664_v9 = vpack.c.bf16 %v948_v7, %v948_v7  ;;  %v300_v10 = vpop.f32.mrf.mxu0  ;;  %v332_v11 = vpop.f32.mrf.mxu1  ;;  %v482_v54 = vadd.f32 %v481_v40, %v480_v50  ;;  %v495_v40 = vsel %vm21_vm0, %v932_v59, 0.0 }
  0xfa   :  { %465 = vst.msk [vmem:[%s1097_s2 + $0x4] sm:$0xf] %vm463_vm4, %v656_v8  ;;  %v351_v12 = vadd.f32 %v300_v10, %v42_v1  ;;  %v359_v14 = vadd.f32 %v332_v11, %v50_v6  ;;  %v536_v57 = vsel %vm21_vm0, %v520_v34, 0.0 }
  0xfb   :  { %473 = vst.msk [vmem:[%s1097_s2 + $0x24] sm:$0xf] %vm463_vm4, %v664_v9  ;;  %v385_v15 = vld [vmem:[#allocation2 + $0x10] sm:$0xff]  ;;  %v302_v16 = vpop.f32.mrf.mxu0  ;;  %v334_v17 = vpop.f32.mrf.mxu1  ;;  %v537_v9 = vadd.f32 %v536_v57, %v535_v3 }
  0xfc   :  { %v962_v19 = vld [vmem:[#allocation2 + $0x50] sm:$0xff]  ;;  %v657_v20 = vpack.c.bf16 %v385_v15, %v385_v15  ;;  %368 = vst.msk [vmem:[#allocation2 + $0x20] sm:$0xff] %vm21_vm0, %v351_v12  ;;  %376 = vst.msk [vmem:[#allocation2 + $0x60] sm:$0xff] %vm21_vm0, %v359_v14  ;;  %v521_v47 = vmul.f32 %v385_v15, %v385_v15  ;;  %v483_v51 = vsel %vm21_vm0, %v385_v15, 0.0 }
  0xfd   :  { %v665_v21 = vpack.c.bf16 %v962_v19, %v962_v19  ;;  %v303_v22 = vpop.f32.mrf.mxu0  ;;  %v335_v23 = vpop.f32.mrf.mxu1  ;;  %v484_v1 = vadd.f32 %v483_v51, %v482_v54 }
  0xfe   :  { %466 = vst.msk [vmem:[%s1097_s2 + $0x8] sm:$0xf] %vm463_vm4, %v657_v20  ;;  %v352_v24 = vadd.f32 %v303_v22, %v43_v13  ;;  %v360_v26 = vadd.f32 %v335_v23, %v51_v18  ;;  %v538_v4 = vsel %vm21_vm0, %v521_v47, 0.0 }
  0xff   :  { %474 = vst.msk [vmem:[%s1097_s2 + $0x28] sm:$0xf] %vm463_vm4, %v665_v21  ;;  %v305_v27 = vpop.f32.mrf.mxu0  ;;  %v337_v28 = vpop.f32.mrf.mxu1  ;;  %v386_v30 = vld [vmem:[#allocation2 + $0x18] sm:$0xff]  ;;  %v539_v14 = vadd.f32 %v538_v4, %v537_v9 }
 0x100   :  { %v976_v31 = vld [vmem:[#allocation2 + $0x58] sm:$0xff]  ;;  %369 = vst.msk [vmem:[#allocation2 + $0x28] sm:$0xff] %vm21_vm0, %v352_v24  ;;  %377 = vst.msk [vmem:[#allocation2 + $0x68] sm:$0xff] %vm21_vm0, %v360_v26  ;;  %v658_v32 = vpack.c.bf16 %v386_v30, %v386_v30  ;;  %v522_v56 = vmul.f32 %v386_v30, %v386_v30  ;;  %v485_v55 = vsel %vm21_vm0, %v386_v30, 0.0 }
 0x101   :  { %v666_v33 = vpack.c.bf16 %v976_v31, %v976_v31  ;;  %v308_v35 = vpop.f32.mrf.mxu0  ;;  %v340_v36 = vpop.f32.mrf.mxu1  ;;  %v486_v10 = vadd.f32 %v485_v55, %v484_v1 }
 0x102   :  { %v353_v37 = vadd.f32 %v308_v35, %v44_v25  ;;  %v361_v39 = vadd.f32 %v340_v36, %v52_v29  ;;  %467 = vst.msk [vmem:[%s1097_s2 + $0xc] sm:$0xf] %vm463_vm4, %v658_v32  ;;  %v540_v12 = vsel %vm21_vm0, %v522_v56, 0.0 }
 0x103   :  { %475 = vst.msk [vmem:[%s1097_s2 + $0x2c] sm:$0xf] %vm463_vm4, %v666_v33  ;;  %v310_v42 = vpop.f32.mrf.mxu0  ;;  %v342_v43 = vpop.f32.mrf.mxu1  ;;  %v387_v45 = vld [vmem:[#allocation2 + $0x20] sm:$0xff]  ;;  %v541_v23 = vadd.f32 %v540_v12, %v539_v14 }
 0x104   :  { %v993_v46 = vld [vmem:[#allocation2 + $0x60] sm:$0xff]  ;;  %370 = vst.msk [vmem:[#allocation2 + $0x30] sm:$0xff] %vm21_vm0, %v353_v37  ;;  %378 = vst.msk [vmem:[#allocation2 + $0x70] sm:$0xff] %vm21_vm0, %v361_v39  ;;  %v659_v48 = vpack.c.bf16 %v387_v45, %v387_v45  ;;  %v523_v2 = vmul.f32 %v387_v45, %v387_v45  ;;  %v487_v8 = vsel %vm21_vm0, %v387_v45, 0.0  ;;  %v527_v39 = vmul.f32 %v932_v59, %v932_v59 }
 0x105   :  { %v667_v49 = vpack.c.bf16 %v993_v46, %v993_v46  ;;  %v311_v52 = vpop.f32.mrf.mxu0  ;;  %v343_v53 = vpop.f32.mrf.mxu1  ;;  %v488_v17 = vadd.f32 %v487_v8, %v486_v10  ;;  %v528_v43 = vmul.f32 %v948_v7, %v948_v7  ;;  %v497_v45 = vsel %vm21_vm0, %v948_v7, 0.0 }
 0x106   :  { %v354_v58 = vadd.f32 %v311_v52, %v45_v38  ;;  %v362_v60 = vadd.f32 %v343_v53, %v53_v44  ;;  %468 = vst.msk [vmem:[%s1097_s2 + $0x10] sm:$0xf] %vm463_vm4, %v659_v48  ;;  %v542_v18 = vsel %vm21_vm0, %v523_v2, 0.0  ;;  %v550_v50 = vsel %vm21_vm0, %v527_v39, 0.0 }
 0x107   :  { %476 = vst.msk [vmem:[%s1097_s2 + $0x30] sm:$0xf] %vm463_vm4, %v667_v49  ;;  %v313_v61 = vpop.f32.mrf.mxu0  ;;  %v345_v62 = vpop.f32.mrf.mxu1  ;;  %v388_v63 = vld [vmem:[#allocation2 + $0x28] sm:$0xff]  ;;  %v543_v27 = vadd.f32 %v542_v18, %v541_v23  ;;  %v529_v49 = vmul.f32 %v962_v19, %v962_v19  ;;  %v499_v59 = vsel %vm21_vm0, %v962_v19, 0.0  ;;  %v530_v53 = vmul.f32 %v976_v31, %v976_v31 }
 0x108   :  { %v1012_v0 = vld [vmem:[#allocation2 + $0x68] sm:$0xff]  ;;  %371 = vst.msk [vmem:[#allocation2 + $0x38] sm:$0xff] %vm21_vm0, %v354_v58  ;;  %379 = vst.msk [vmem:[#allocation2 + $0x78] sm:$0xff] %vm21_vm0, %v362_v60  ;;  %v660_v5 = vpack.c.bf16 %v388_v63, %v388_v63  ;;  %v524_v11 = vmul.f32 %v388_v63, %v388_v63  ;;  %v489_v13 = vsel %vm21_vm0, %v388_v63, 0.0  ;;  %v552_v54 = vsel %vm21_vm0, %v528_v43, 0.0 }
 0x109   :  { %v668_v6 = vpack.c.bf16 %v1012_v0, %v1012_v0  ;;  %v490_v24 = vadd.f32 %v489_v13, %v488_v17  ;;  %v501_v7 = vsel %vm21_vm0, %v976_v31, 0.0  ;;  %v531_v58 = vmul.f32 %v993_v46, %v993_v46 }
 0x10a   :  { %469 = vst.msk [vmem:[%s1097_s2 + $0x14] sm:$0xf] %vm463_vm4, %v660_v5  ;;  %v544_v26 = vsel %vm21_vm0, %v524_v11, 0.0  ;;  %v554_v60 = vsel %vm21_vm0, %v529_v49, 0.0  ;;  %v503_v19 = vsel %vm21_vm0, %v993_v46, 0.0  ;;  %v532_v62 = vmul.f32 %v1012_v0, %v1012_v0 }
 0x10b   :  { %477 = vst.msk [vmem:[%s1097_s2 + $0x34] sm:$0xf] %vm463_vm4, %v668_v6  ;;  %v389_v15 = vld [vmem:[#allocation2 + $0x30] sm:$0xff]  ;;  %v545_v36 = vadd.f32 %v544_v26, %v543_v27  ;;  %v556_v63 = vsel %vm21_vm0, %v530_v53, 0.0  ;;  %v505_v31 = vsel %vm21_vm0, %v1012_v0, 0.0  ;;  %v558_v4 = vsel %vm21_vm0, %v531_v58, 0.0 }
 0x10c   :  { %v397_v16 = vld [vmem:[#allocation2 + $0x70] sm:$0xff]  ;;  %v661_v20 = vpack.c.bf16 %v389_v15, %v389_v15  ;;  %v491_v22 = vsel %vm21_vm0, %v389_v15, 0.0  ;;  %v525_v25 = vmul.f32 %v389_v15, %v389_v15  ;;  %v560_v9 = vsel %vm21_vm0, %v532_v62, 0.0 }
 0x10d   :  { %v669_v21 = vpack.c.bf16 %v397_v16, %v397_v16  ;;  %v492_v30 = vadd.f32 %v491_v22, %v490_v24  ;;  %v533_v3 = vmul.f32 %v397_v16, %v397_v16  ;;  %v507_v5 = vsel %vm21_vm0, %v397_v16, 0.0 }
 0x10e   :  { %470 = vst.msk [vmem:[%s1097_s2 + $0x18] sm:$0xf] %vm463_vm4, %v661_v20  ;;  %v546_v32 = vsel %vm21_vm0, %v525_v25, 0.0 }
 0x10f   :  { %478 = vst.msk [vmem:[%s1097_s2 + $0x38] sm:$0xf] %vm463_vm4, %v669_v21  ;;  %v390_v28 = vld [vmem:[#allocation2 + $0x38] sm:$0xff]  ;;  %v547_v41 = vadd.f32 %v546_v32, %v545_v36  ;;  %v562_v13 = vsel %vm21_vm0, %v533_v3, 0.0 }
 0x110   :  { %v398_v29 = vld [vmem:[#allocation2 + $0x78] sm:$0xff]  ;;  %v662_v33 = vpack.c.bf16 %v390_v28, %v390_v28  ;;  %v493_v35 = vsel %vm21_vm0, %v390_v28, 0.0  ;;  %v526_v38 = vmul.f32 %v390_v28, %v390_v28 }
 0x111   :  { %v670_v34 = vpack.c.bf16 %v398_v29, %v398_v29  ;;  %v494_v37 = vadd.f32 %v493_v35, %v492_v30  ;;  %v534_v46 = vmul.f32 %v398_v29, %v398_v29  ;;  %v509_v10 = vsel %vm21_vm0, %v398_v29, 0.0 }
 0x112   :  { %471 = vst.msk [vmem:[%s1097_s2 + $0x1c] sm:$0xf] %vm463_vm4, %v662_v33  ;;  %v548_v44 = vsel %vm21_vm0, %v526_v38, 0.0 }
 0x113   :  { %479 = vst.msk [vmem:[%s1097_s2 + $0x3c] sm:$0xf] %vm463_vm4, %v670_v34  ;;  %v496_v42 = vadd.f32 %v495_v40, %v494_v37  ;;  %v549_v47 = vadd.f32 %v548_v44, %v547_v41  ;;  %v564_v15 = vsel %vm21_vm0, %v534_v46, 0.0  ;;  %s777_s2 = smov [#allocation3]  }
 0x114   :  { %s581_s17 = sshll.u32 %s777_s2, 4  ;;  %s582_s17 = int_to_ptr.vmem [resolvable:$true] %s581_s17 }
 0x115   :  { %v498_v48 = vadd.f32 %v497_v45, %v496_v42  ;;  %v551_v51 = vadd.f32 %v550_v50, %v549_v47  ;;  %s730_s19 = scalar_lea.vmem %s582_s17, 16  ;;  %s734_s20 = scalar_lea.vmem %s582_s17, 32 }
 0x116   :  { %p731_p0 = scmp.ne.s32.totalorder %s582_s17, %s730_s19  ;;  %p735_p1 = scmp.lt.s32.totalorder %s582_s17, %s582_s17 }
 0x117   :  { %v500_v52 = vadd.f32 %v499_v59, %v498_v48  ;;  %v553_v56 = vadd.f32 %v552_v54, %v551_v51  ;;  %p736_p2 = scmp.lt.s32.totalorder %s734_s20, %s730_s19 }
 0x119   :  { %v502_v57 = vadd.f32 %v501_v7, %v500_v52  ;;  %v555_v55 = vadd.f32 %v554_v60, %v553_v56  ;;  %p737_p3 = por %p736_p2, %p735_p1 }
 0x11b   :  { %v504_v61 = vadd.f32 %v503_v19, %v502_v57  ;;  %v557_v1 = vadd.f32 %v556_v63, %v555_v55  ;;  %p738_p4 = pnand %p737_p3, %p731_p0 }
 0x11d   :  { %v506_v2 = vadd.f32 %v505_v31, %v504_v61  ;;  %v559_v6 = vadd.f32 %v558_v4, %v557_v1 }
 0x11f   :  { %v508_v8 = vadd.f32 %v507_v5, %v506_v2  ;;  %v561_v11 = vadd.f32 %v560_v9, %v559_v6 }
 0x121   :  { %v510_v12 = vadd.f32 %v509_v10, %v508_v8  ;;  %v563_v14 = vadd.f32 %v562_v13, %v561_v11 }
 0x123   :  { %v511_v0 = vrot.slane %v510_v12, 4  ;;  %v565_v17 = vadd.f32 %v564_v15, %v563_v14 }
 0x125   :  { %v512_v18 = vadd.f32 %v511_v0, %v510_v12  ;;  %v566_v20 = vrot.slane %v565_v17, 4 }
 0x127   :  { %v513_v21 = vrot.slane %v512_v18, 2  ;;  %v567_v16 = vadd.f32 %v566_v20, %v565_v17 }
 0x129   :  { %v514_v22 = vadd.f32 %v513_v21, %v512_v18  ;;  %v568_v23 = vrot.slane %v567_v16, 2 }
 0x12b   :  { %v515_v24 = vrot.slane %v514_v22, 1  ;;  %v569_v25 = vadd.f32 %v568_v23, %v567_v16 }
 0x12d   :  { %v516_v26 = vadd.f32 %v515_v24, %v514_v22  ;;  %v570_v27 = vrot.slane %v569_v25, 1 }
 0x12f   :  { %518 = vst.msk [vmem:[#allocation3] sm:$0x1] %vm517_vm5, %v516_v26 }
 0x130   :  { %741 = shalt.err (!%p738_p4)
}
 0x131   :  { %584 = dma.vmem_to_hbm [thread:$0]  %s582_s17, 16, %s1098_s3, [#allocation4]   ;;  %v571_v28 = vadd.f32 %v570_v27, %v569_v25 }
 0x132   :  { %s750_s23 = scalar_lea.vmem %s592_s1, 16  ;;  %s754_s24 = scalar_lea.vmem %s592_s1, 32 }
 0x133   :  { %572 = vst.msk [vmem:[#allocation5] sm:$0x1] %vm517_vm5, %v571_v28  ;;  %p751_p5 = scmp.ne.s32.totalorder %s592_s1, %s750_s23  ;;  %p755_p6 = scmp.lt.s32.totalorder %s592_s1, %s592_s1 }
 0x134   :  { %p756_p7 = scmp.lt.s32.totalorder %s754_s24, %s750_s23 }
 0x136   :  { %p757_p8 = por %p756_p7, %p755_p6 }
 0x138   :  { %p758_p9 = pnand %p757_p8, %p751_p5 }
 0x13a   :  { %761 = shalt.err (!%p758_p9)
}
 0x13b   :  { %594 = dma.vmem_to_hbm [thread:$0]  %s592_s1, 16, %s1099_s4, [#allocation6]  }
 0x13c   :  { %770 = dma.done.wait [#allocation4], 16  }
 0x13d   :  { %771 = vsyncadd [#allocation4], 4294967280 }
 0x13e   :  { %772 = dma.done.wait [#allocation6], 16  }
 0x13f   :  { %773 = vsyncadd [#allocation6], 4294967280 }
 0x140   :  { %603 = vsyncpa [#allocation4], 1 }
 0x141   :  { %604 = vsyncpa [#allocation6], 1 }

</bundles_post_ra>
